<compile_context>
chip_gen: v7x
topology: tpu7x:2x2x1
jax: 0.10.0
libtpu: 0.0.40
codegen_flags: <defaults>
</compile_context>

<pallas_src>
import functools

import jax
import jax.numpy as jnp
from jax.experimental import pallas as pl
from jax.experimental.pallas import tpu as pltpu


# ---------------------------------------------------------------------------
# Kernel 1: mean voxel feature encoder (pcd_encoder), tiled over M.
# ---------------------------------------------------------------------------
def _vfe_mean_kernel(vox_ref, npts_ref, o_ref):
    # vox_ref : (tm, P, D) voxel points (padded points are zero)
    # npts_ref: (tm, 1)    number of valid points per voxel (float32)
    # o_ref   : (tm, D)    mean point feature per voxel
    s = jnp.sum(vox_ref[...], axis=1)                               # (tm, D)
    inv = pl.reciprocal(jnp.maximum(npts_ref[...], 1.0), approx=True)
    o_ref[...] = (s * inv).astype(o_ref.dtype)


def vfe_mean(voxels, num_points, *, tm=1024):
    # NOTE: with D=4 each vreg uses 4/128 lanes; at this size the kernel is
    # pure index plumbing (it could equally be folded into the scatter).  The
    # M-tiled "parallel" grid keeps blocks VMEM-sized at realistic M.
    M, P, D = voxels.shape
    tm = min(tm, M)
    npts = num_points.astype(jnp.float32).reshape(M, 1)
    return pl.pallas_call(
        _vfe_mean_kernel,
        out_shape=jax.ShapeDtypeStruct((M, D), jnp.float32),
        grid=(pl.cdiv(M, tm),),
        in_specs=[
            pl.BlockSpec((tm, P, D), lambda i: (i, 0, 0)),
            pl.BlockSpec((tm, 1), lambda i: (i, 0)),
        ],
        out_specs=pl.BlockSpec((tm, D), lambda i: (i, 0)),
        compiler_params=pltpu.CompilerParams(
            dimension_semantics=("parallel",)),
    )(voxels, npts)


# ---------------------------------------------------------------------------
# Glue: PointPillarsScatter onto a PRE-TILED, HALO-PADDED BEV canvas.
#
# Tile (b, t) of the result holds BEV rows [t*tile_h - 2, t*tile_h + tile_h + 2)
# and cols [-2, W+2) of batch b (zeros outside the grid).  The fused conv
# kernel therefore needs no in-kernel halo copies and no overlapping
# BlockSpec windows.  Halo duplication is pure index math on the M voxels
# (voxels with row % tile_h in {0,1,tile_h-2,tile_h-1} are written twice);
# the zero-fill that SAME padding needs is the zero-fill the scatter does
# anyway, so there is no extra HBM canvas pass for padding.
# ---------------------------------------------------------------------------
def pillars_scatter_tiled(voxel_feats, coors, batch_size, grid_hw, tile_h):
    H, W = grid_hw
    assert H % tile_h == 0, "tile_h must divide the BEV height"
    nH = H // tile_h
    feats = voxel_feats.astype(jnp.bfloat16)
    b, y, x = coors[:, 0], coors[:, 2], coors[:, 3]
    valid = b >= 0

    flat_all, row_all, col_all, val_all = [], [], [], []
    oob_flat = batch_size * nH
    oob_row = tile_h + 4
    oob_col = W + 4
    for d in (-1, 0, 1):
        t = y // tile_h + d                     # candidate tile row
        ly = y - t * tile_h + 2                 # local row inside that tile
        ok = (valid & (t >= 0) & (t < nH) & (ly >= 0) & (ly < tile_h + 4))
        flat_all.append(jnp.where(ok, b * nH + t, oob_flat))
        row_all.append(jnp.where(ok, ly, oob_row))
        col_all.append(jnp.where(ok, x + 2, oob_col))
        val_all.append(feats)
    flat = jnp.concatenate(flat_all)
    row = jnp.concatenate(row_all)
    col = jnp.concatenate(col_all)
    vals = jnp.concatenate(val_all, axis=0)

    canvas = jnp.zeros((batch_size * nH, tile_h + 4, W + 4, feats.shape[-1]),
                       jnp.bfloat16)
    # TODO(synk): at realistic sizes fuse this zero-fill + scatter into a
    # Pallas kernel (PrefetchScalarGridSpec over voxel coords) or alias the
    # canvas buffer so XLA does not spend a separate full-canvas HBM pass.
    return canvas.at[flat, row, col].set(vals, mode="drop")


# ---------------------------------------------------------------------------
# Kernel 2: fused backbone conv + neck conv (3x3 SAME, bias, ReLU) x 2.
# One pallas_call, grid = (B, H // tile_h); the conv1 output never leaves the
# kernel.  Each conv is 9 accumulating matmuls over shifted views; no im2col
# scratch, no masked lane-offset stores, no cross-step state.
# ---------------------------------------------------------------------------
def _fused_conv3x3_kernel(x_ref, w1_ref, b1_ref, w2_ref, b2_ref, o_ref,
                          *, TH, H, W, Cin, Cmid, Cout):
    # x_ref : (1, TH+4, W+4, Cin) bf16  halo-padded input window for this tile
    # w1_ref: (9, Cin, Cmid)      bf16  backbone conv weights, tap-major
    # b1_ref: (1, Cmid)           f32
    # w2_ref: (9, Cmid, Cout)     bf16  neck conv weights, tap-major
    # b2_ref: (1, Cout)           f32
    # o_ref : (1, TH, W, Cout)    bf16  output rows [h*TH, h*TH+TH)
    h = pl.program_id(1)
    R1, W1 = TH + 2, W + 2                      # conv1 output window (mid)

    xw = x_ref[0]                               # (TH+4, W+4, Cin) bf16

    # ---- conv 1 (backbone): 9 accumulating matmuls over shifted views ------
    acc1 = None
    for t in range(9):
        ky, kx = divmod(t, 3)
        tap = xw[ky:ky + R1, kx:kx + W1, :].reshape(R1 * W1, Cin)
        d = jnp.dot(tap, w1_ref[t], preferred_element_type=jnp.float32)
        acc1 = d if acc1 is None else acc1 + d
    mid = jnp.maximum(acc1 + b1_ref[...], 0.0).reshape(R1, W1, Cmid)

    # conv2's SAME padding ring: zero mid positions that fall outside the BEV
    # grid (rows < 0 / >= H at the tile boundary, cols outside [0, W)).
    r = jax.lax.broadcasted_iota(jnp.int32, (R1, W1, 1), 0)
    c = jax.lax.broadcasted_iota(jnp.int32, (R1, W1, 1), 1)
    gr = r + (h * TH - 1)                       # global BEV row of this mid row
    valid = (gr >= 0) & (gr < H) & (c >= 1) & (c <= W)
    mid = jnp.where(valid, mid, 0.0).astype(jnp.bfloat16)

    # ---- conv 2 (neck): same pattern over the resident mid value -----------
    acc2 = None
    for t in range(9):
        ky, kx = divmod(t, 3)
        tap = mid[ky:ky + TH, kx:kx + W, :].reshape(TH * W, Cmid)
        d = jnp.dot(tap, w2_ref[t], preferred_element_type=jnp.float32)
        acc2 = d if acc2 is None else acc2 + d
    out = jnp.maximum(acc2 + b2_ref[...], 0.0)
    o_ref[0] = out.reshape(TH, W, Cout).astype(o_ref.dtype)


def fused_backbone_neck_conv(canvas_tiled, w1, b1, w2, b2,
                             *, batch, H, W, tile_h):
    """Two chained 3x3 SAME convs + bias + ReLU, grid = (batch, H // tile_h)."""
    BT, THp4, Wp4, Cin = canvas_tiled.shape
    TH = THp4 - 4
    assert TH == tile_h and Wp4 == W + 4 and H % TH == 0
    nH = H // TH
    assert BT == batch * nH
    Cmid = w1.shape[-1]
    Cout = w2.shape[-1]

    # Tap-major weights (t = ky*3 + kx), bf16 for the MXU; f32 accumulation.
    w1f = w1.reshape(9, Cin, Cmid).astype(jnp.bfloat16)
    w2f = w2.reshape(9, Cmid, Cout).astype(jnp.bfloat16)
    b1f = b1.reshape(1, Cmid).astype(jnp.float32)
    b2f = b2.reshape(1, Cout).astype(jnp.float32)

    kernel = functools.partial(_fused_conv3x3_kernel,
                               TH=TH, H=H, W=W, Cin=Cin, Cmid=Cmid, Cout=Cout)

    flops = 2 * batch * H * W * 9 * (Cin * Cmid + Cmid * Cout)
    bytes_accessed = (canvas_tiled.size * 2 + w1f.size * 2 + w2f.size * 2
                      + b1f.size * 4 + b2f.size * 4
                      + batch * H * W * Cout * 2)

    return pl.pallas_call(
        kernel,
        out_shape=jax.ShapeDtypeStruct((batch, H, W, Cout), jnp.bfloat16),
        grid=(batch, nH),
        in_specs=[
            pl.BlockSpec((1, TH + 4, W + 4, Cin),
                         lambda b, h: (b * nH + h, 0, 0, 0)),
            pl.BlockSpec((9, Cin, Cmid), lambda b, h: (0, 0, 0)),
            pl.BlockSpec((1, Cmid), lambda b, h: (0, 0)),
            pl.BlockSpec((9, Cmid, Cout), lambda b, h: (0, 0, 0)),
            pl.BlockSpec((1, Cout), lambda b, h: (0, 0)),
        ],
        out_specs=pl.BlockSpec((1, TH, W, Cout), lambda b, h: (b, h, 0, 0)),
        compiler_params=pltpu.CompilerParams(
            dimension_semantics=("parallel", "parallel"),
            vmem_limit_bytes=64 * 1024 * 1024),
        cost_estimate=pl.CostEstimate(flops=flops, transcendentals=0,
                                      bytes_accessed=bytes_accessed),
    )(canvas_tiled, w1f, b1f, w2f, b2f)


# ---------------------------------------------------------------------------
# Deterministic parameter init (synthetic; no checkpoint loading)
# ---------------------------------------------------------------------------
def init_params(key, d_in, c_hidden):
    k1, k2, k3, k4 = jax.random.split(key, 4)
    return dict(
        w_backbone=0.1 * jax.random.normal(k1, (3, 3, d_in, c_hidden), jnp.float32),
        b_backbone=0.01 * jax.random.normal(k2, (c_hidden,), jnp.float32),
        w_neck=0.1 * jax.random.normal(k3, (3, 3, c_hidden, c_hidden), jnp.float32),
        b_neck=0.01 * jax.random.normal(k4, (c_hidden,), jnp.float32),
    )


# ---------------------------------------------------------------------------
# CenterPoint.forward
# ---------------------------------------------------------------------------
def center_point_forward(example, params, *, tile_h=8):
    voxels = example['voxels']            # (M, P, D)
    coors = example['coordinates']        # (M, 4) int32 (batch, z, y, x)
    num_points = example['num_points']    # (M,)
    batch_size = len(example['num_voxels'])
    Wg, Hg, _ = example['shape'][0]       # static python ints (jit-safe)

    feats = vfe_mean(voxels, num_points)                               # Pallas
    canvas_t = pillars_scatter_tiled(feats, coors, batch_size,
                                     (Hg, Wg), tile_h)                 # JAX glue
    x = fused_backbone_neck_conv(canvas_t,
                                 params['w_backbone'], params['b_backbone'],
                                 params['w_neck'], params['b_neck'],
                                 batch=batch_size, H=Hg, W=Wg,
                                 tile_h=tile_h)                        # Pallas
    # NHWC bf16; the PyTorch NCHW transpose is intentionally skipped
    # (perf feedback: emit the layout the consumer wants, no extra HBM pass).
    return x                                                           # (B,H,W,C)


# Pure-JAX reference (f32, highest precision, NHWC) for the correctness check.
def _reference_forward(example, params):
    voxels = example['voxels']
    npts = jnp.maximum(example['num_points'].astype(jnp.float32), 1.0)
    feats = voxels.sum(axis=1) / npts[:, None]
    batch_size = len(example['num_voxels'])
    Wg, Hg, _ = example['shape'][0]
    coors = example['coordinates']
    b, y, x = coors[:, 0], coors[:, 2], coors[:, 3]
    bb = jnp.where(b >= 0, b, batch_size)
    canvas = jnp.zeros((batch_size, Hg, Wg, feats.shape[-1]), jnp.float32)
    canvas = canvas.at[bb, y, x].set(feats, mode="drop")

    def conv(x, w, bias):
        y = jax.lax.conv_general_dilated(
            x, w, (1, 1), 'SAME',
            dimension_numbers=('NHWC', 'HWIO', 'NHWC'),
            precision=jax.lax.Precision.HIGHEST)
        return jnp.maximum(y + bias, 0.0)

    x = conv(canvas, params['w_backbone'], params['b_backbone'])
    x = conv(x, params['w_neck'], params['b_neck'])
    return x                                                           # NHWC f32


if __name__ == "__main__":
    key = jax.random.PRNGKey(0)
    M, P, D = 32, 8, 4          # voxels, max points/voxel, point feature dim
    B, H, W, C = 2, 16, 16, 32  # batch, BEV grid, hidden channels
    TILE_H = 8                  # -> grid (2, 2); sweep 64/128 at realistic H

    k1, k2, k3 = jax.random.split(key, 3)
    voxels = jax.random.normal(k1, (M, P, D), jnp.float32)
    num_points = jax.random.randint(k2, (M,), 1, P + 1, jnp.int32)
    # zero out padded points (matches real voxelization output)
    point_mask = (jnp.arange(P)[None, :] < num_points[:, None]).astype(jnp.float32)
    voxels = voxels * point_mask[:, :, None]

    # unique BEV cells per voxel (real voxelization produces unique coords)
    cells = jax.random.permutation(k3, H * W)[:M].astype(jnp.int32)
    batch_idx = jnp.repeat(jnp.arange(B, dtype=jnp.int32), M // B)
    coordinates = jnp.stack(
        [batch_idx, jnp.zeros((M,), jnp.int32), cells // W, cells % W], axis=1)

    example = dict(
        voxels=voxels,
        coordinates=coordinates,
        num_points=num_points,
        num_voxels=[M // B] * B,   # python list -> len() gives static batch size
        shape=((W, H, 1),),        # static python ints
    )
    params = init_params(jax.random.PRNGKey(42), D, C)

    out = jax.block_until_ready(center_point_forward(example, params,
                                                     tile_h=TILE_H))
    assert out.shape == (B, H, W, C), out.shape
    out_f32 = out.astype(jnp.float32)
    assert bool(jnp.all(jnp.isfinite(out_f32)))

    ref = jax.block_until_ready(_reference_forward(example, params))
    max_err = float(jnp.max(jnp.abs(out_f32 - ref)))
    # bf16 canvas / weights / mid / output and the EUP approx reciprocal in the
    # VFE are intentional; error budget is well inside the tolerance below.
    assert max_err < 1e-1, f"mismatch vs reference: max_err={max_err}"
    print("KERNEL_OK")
</pallas_src>

<mosaic_0001>
module attributes {stable_mosaic.version = 11 : i64} {
  func.func @_vfe_mean_kernel(%arg0: i32, %arg1: memref<32x8x4xf32, #tpu.memory_space<vmem>>, %arg2: memref<32x1xf32, #tpu.memory_space<vmem>>, %arg3: memref<32x4xf32, #tpu.memory_space<vmem>>) attributes {dimension_semantics = [#tpu.dimension_semantics<parallel>], iteration_bounds = array<i64: 1>, scalar_prefetch = 0 : i64, scratch_operands = 0 : i64, tpu.core_type = #tpu.core_type<tc>, window_params = [{transform_indices = @transform_0, window_bounds = array<i64: 32, 8, 4>}, {transform_indices = @transform_1, window_bounds = array<i64: 32, 1>}, {transform_indices = @transform_2, window_bounds = array<i64: 32, 4>}]} {
    %c0 = arith.constant 0 : index
    %c0_0 = arith.constant 0 : index
    %c0_1 = arith.constant 0 : index
    %0 = vector.load %arg1[%c0, %c0_0, %c0_1] : memref<32x8x4xf32, #tpu.memory_space<vmem>>, vector<32x8x4xf32>
    %cst = arith.constant dense<0.000000e+00> : vector<32x4xf32>
    %1 = vector.multi_reduction <add>, %0, %cst [1] : vector<32x8x4xf32> to vector<32x4xf32>
    %c0_2 = arith.constant 0 : index
    %c0_3 = arith.constant 0 : index
    %2 = vector.load %arg2[%c0_2, %c0_3] : memref<32x1xf32, #tpu.memory_space<vmem>>, vector<32x1xf32>
    %cst_4 = arith.constant 1.000000e+00 : f32
    %3 = vector.broadcast %cst_4 : f32 to vector<32x1xf32>
    %4 = arith.maximumf %2, %3 : vector<32x1xf32>
    %5 = tpu.reciprocal %4 {approx = true} : vector<32x1xf32> -> vector<32x1xf32>
    %6 = vector.broadcast %5 : vector<32x1xf32> to vector<32x4xf32>
    %7 = arith.mulf %1, %6 : vector<32x4xf32>
    %c0_5 = arith.constant 0 : index
    %c0_6 = arith.constant 0 : index
    %8 = vector.load %arg3[%c0_5, %c0_6] : memref<32x4xf32, #tpu.memory_space<vmem>>, vector<32x4xf32>
    tpu.vector_store %arg3[%c0_5, %c0_6], %7 {strides = array<i32>} : memref<32x4xf32, #tpu.memory_space<vmem>>, vector<32x4xf32>,
    return
  }
  func.func @transform_0(%arg0: i32) -> (i32, i32, i32) {
    %c0_i32 = arith.constant 0 : i32
    %c0_i32_0 = arith.constant 0 : i32
    %c0_i32_1 = arith.constant 0 : i32
    return %arg0, %c0_i32, %c0_i32_0 : i32, i32, i32
  }
  func.func @transform_1(%arg0: i32) -> (i32, i32) {
    %c0_i32 = arith.constant 0 : i32
    %c0_i32_0 = arith.constant 0 : i32
    return %arg0, %c0_i32 : i32, i32
  }
  func.func @transform_2(%arg0: i32) -> (i32, i32) {
    %c0_i32 = arith.constant 0 : i32
    %c0_i32_0 = arith.constant 0 : i32
    return %arg0, %c0_i32 : i32, i32
  }
}

</mosaic_0001>

<bundles_post_ra>
// kernel: tpu_custom_call.1
= control target key start
LH: loop header
LB: loop body
LE: loop exit
PB: predicated region body
PF: predicated region fallthrough
CT: control target
= control target key end

     0   :  { %v506_v0 = vmov 0   ;;  %vm43_vm0 = vcmask 31744   ;;  %vm421_vm1 = vcmask 1041409   ;;  %vm424_vm2 = vcmask 1042434   ;;  %s837_s1 = inlined_call_operand.vmem [shape: f32[32,1], index: 1, kind: input, shape index: {}]   ;;  %s838_s0 = inlined_call_operand.vmem [shape: f32[32,8,4], index: 0, kind: input, shape index: {}]   ;;  %s839_s2 = inlined_call_operand.vmem [shape: f32[32,4], index: 2, kind: output, shape index: {}]  }
   0x1   :  { %497 = vset.pattern.permute.xlu1 %v506_v0  ;;  %496 = vset.pattern.permute.xlu0 %v506_v0  ;;  %v270_v1 = vld [vmem:[%s837_s1 + $0x10] sm:$0xff]  ;;  %v271_v2 = vld [vmem:[%s837_s1 + $0x18] sm:$0xff]  ;;  %v269_v5 = vld [vmem:[%s837_s1 + $0x8] sm:$0xff]  ;;  %vm427_vm3 = vcmask 1043459   ;;  %vm430_vm4 = vcmask 1044484   ;;  %vm433_vm5 = vcmask 1045509  }
   0x2   :  { %v274_v3 = vmax.f32 %v270_v1, 1.0  ;;  %v275_v4 = vmax.f32 %v271_v2, 1.0  ;;  %v268_v6 = vld [vmem:[%s837_s1] sm:$0xff]  ;;  %v273_v8 = vmax.f32 %v269_v5, 1.0  ;;  %v28_v14 = vld [vmem:[%s838_s0 + $0x88] sm:$0xff]  ;;  %v29_v15 = vld [vmem:[%s838_s0 + $0x90] sm:$0xff] }
   0x3   :  { %v272_v7 = vmax.f32 %v268_v6, 1.0  ;;  %v27_v13 = vld [vmem:[%s838_s0 + $0x80] sm:$0xff]  ;;  %v30_v16 = vld [vmem:[%s838_s0 + $0x98] sm:$0xff]  ;;  %v32_v18 = vld [vmem:[%s838_s0 + $0xa8] sm:$0xff]  ;;  %v163_v22 = vsel %vm43_vm0, %v28_v14, 0.0  ;;  %v170_v23 = vsel %vm43_vm0, %v29_v15, 0.0 }
   0x4   :  { %498 = vrcp.f32 %v274_v3  ;;  %v31_v17 = vld [vmem:[%s838_s0 + $0xa0] sm:$0xff]  ;;  %v33_v19 = vld [vmem:[%s838_s0 + $0xb0] sm:$0xff]  ;;  %v156_v21 = vsel %vm43_vm0, %v27_v13, 0.0  ;;  %v34_v24 = vld [vmem:[%s838_s0 + $0xb8] sm:$0xff]  ;;  %v177_v25 = vsel %vm43_vm0, %v30_v16, 0.0  ;;  %v191_v27 = vsel %vm43_vm0, %v32_v18, 0.0 }
   0x5   :  { %500 = vrcp.f32 %v275_v4  ;;  %v11_v20 = vld [vmem:[%s838_s0] sm:$0xff]  ;;  %v184_v26 = vsel %vm43_vm0, %v31_v17, 0.0  ;;  %v12_v28 = vld [vmem:[%s838_s0 + $0x8] sm:$0xff]  ;;  %v198_v29 = vsel %vm43_vm0, %v33_v19, 0.0  ;;  %v13_v30 = vld [vmem:[%s838_s0 + $0x10] sm:$0xff]  ;;  %v157_v34 = vrot.slane %v156_v21, 4 }
   0x6   :  { %502 = vrcp.f32 %v272_v7  ;;  %v14_v31 = vld [vmem:[%s838_s0 + $0x18] sm:$0xff]  ;;  %v15_v32 = vld [vmem:[%s838_s0 + $0x20] sm:$0xff]  ;;  %v44_v33 = vsel %vm43_vm0, %v11_v20, 0.0  ;;  %v164_v35 = vrot.slane %v163_v22, 4  ;;  %v171_v36 = vrot.slane %v170_v23, 4  ;;  %v16_v37 = vld [vmem:[%s838_s0 + $0x28] sm:$0xff] }
   0x7   :  { %504 = vrcp.f32 %v273_v8  ;;  %v17_v38 = vld [vmem:[%s838_s0 + $0x30] sm:$0xff]  ;;  %v18_v39 = vld [vmem:[%s838_s0 + $0x38] sm:$0xff]  ;;  %v178_v40 = vrot.slane %v177_v25, 4  ;;  %v185_v41 = vrot.slane %v184_v26, 4  ;;  %v192_v42 = vrot.slane %v191_v27, 4 }
   0x8   :  { %v205_v43 = vsel %vm43_vm0, %v34_v24, 0.0  ;;  %v199_v44 = vrot.slane %v198_v29, 4  ;;  %v51_v45 = vsel %vm43_vm0, %v12_v28, 0.0  ;;  %v58_v46 = vsel %vm43_vm0, %v13_v30, 0.0 }
   0x9   :  { %v65_v47 = vsel %vm43_vm0, %v14_v31, 0.0  ;;  %v72_v48 = vsel %vm43_vm0, %v15_v32, 0.0  ;;  %v79_v49 = vsel %vm43_vm0, %v16_v37, 0.0  ;;  %v86_v50 = vsel %vm43_vm0, %v17_v38, 0.0 }
   0xa   :  { %v93_v51 = vsel %vm43_vm0, %v18_v39, 0.0  ;;  %v158_v52 = vadd.f32 %v157_v34, %v156_v21  ;;  %v165_v53 = vadd.f32 %v164_v35, %v163_v22  ;;  %v172_v54 = vadd.f32 %v171_v36, %v170_v23 }
   0xb   :  { %v206_v55 = vrot.slane %v205_v43, 4  ;;  %v45_v56 = vrot.slane %v44_v33, 4  ;;  %v52_v57 = vrot.slane %v51_v45, 4  ;;  %v59_v58 = vrot.slane %v58_v46, 4 }
   0xc   :  { %v66_v59 = vrot.slane %v65_v47, 4  ;;  %v73_v60 = vrot.slane %v72_v48, 4  ;;  %v80_v61 = vrot.slane %v79_v49, 4  ;;  %v87_v62 = vrot.slane %v86_v50, 4 }
   0xd   :  { %v94_v63 = vrot.slane %v93_v51, 4  ;;  %v179_v0 = vadd.f32 %v178_v40, %v177_v25  ;;  %v186_v1 = vadd.f32 %v185_v41, %v184_v26  ;;  %v193_v2 = vadd.f32 %v192_v42, %v191_v27 }
   0xe   :  { %v499_v9 = vpop.eup %498  ;;  %v200_v3 = vadd.f32 %v199_v44, %v198_v29  ;;  %v159_v4 = vrot.slane %v158_v52, 2  ;;  %v166_v5 = vrot.slane %v165_v53, 2  ;;  %v173_v6 = vrot.slane %v172_v54, 2 }
   0xf   :  { %290 = vperm.xlu1 %497, %v499_v9   ;;  %v501_v10 = vpop.eup %500  ;;  %v207_v7 = vadd.f32 %v206_v55, %v205_v43  ;;  %v46_v8 = vadd.f32 %v45_v56, %v44_v33  ;;  %v53_v9 = vadd.f32 %v52_v57, %v51_v45  ;;  %v81_v13 = vadd.f32 %v80_v61, %v79_v49  ;;  %v35_v56 = vld [vmem:[%s838_s0 + $0xc0] sm:$0xff]  ;;  %v36_v61 = vld [vmem:[%s838_s0 + $0xc8] sm:$0xff] }
  0x10   :  { %v503_v11 = vpop.eup %502  ;;  %v88_v14 = vadd.f32 %v87_v62, %v86_v50  ;;  %v95_v15 = vadd.f32 %v94_v63, %v93_v51  ;;  %v180_v16 = vrot.slane %v179_v0, 2  ;;  %v187_v17 = vrot.slane %v186_v1, 2  ;;  %v37_v62 = vld [vmem:[%s838_s0 + $0xd0] sm:$0xff] }
  0x11   :  { %282 = vperm.xlu0 %496, %v503_v11   ;;  %v505_v12 = vpop.eup %504  ;;  %v67_v11 = vadd.f32 %v66_v59, %v65_v47  ;;  %v194_v18 = vrot.slane %v193_v2, 2  ;;  %v201_v19 = vrot.slane %v200_v3, 2  ;;  %v160_v20 = vadd.f32 %v159_v4, %v158_v52 }
  0x12   :  { %v167_v21 = vadd.f32 %v166_v5, %v165_v53  ;;  %v174_v22 = vadd.f32 %v173_v6, %v172_v54  ;;  %v208_v23 = vrot.slane %v207_v7, 2  ;;  %v47_v24 = vrot.slane %v46_v8, 2 }
  0x13   :  { %294 = vperm.xlu1 %497, %v501_v10   ;;  %v60_v10 = vadd.f32 %v59_v58, %v58_v46  ;;  %v54_v25 = vrot.slane %v53_v9, 2  ;;  %v68_v27 = vrot.slane %v67_v11, 2  ;;  %v82_v29 = vrot.slane %v81_v13, 2 }
  0x14   :  { %v89_v30 = vrot.slane %v88_v14, 2  ;;  %v96_v31 = vrot.slane %v95_v15, 2  ;;  %v181_v32 = vadd.f32 %v180_v16, %v179_v0  ;;  %v188_v33 = vadd.f32 %v187_v17, %v186_v1 }
  0x15   :  { %286 = vperm.xlu0 %496, %v505_v12   ;;  %v74_v12 = vadd.f32 %v73_v60, %v72_v48  ;;  %v61_v26 = vrot.slane %v60_v10, 2  ;;  %v195_v34 = vadd.f32 %v194_v18, %v193_v2  ;;  %v202_v35 = vadd.f32 %v201_v19, %v200_v3  ;;  %v42_v19 = vld [vmem:[%s838_s0 + $0xf8] sm:$0xff] }
  0x16   :  { %v161_v36 = vrot.slane %v160_v20, 1  ;;  %v168_v37 = vrot.slane %v167_v21, 1  ;;  %v175_v38 = vrot.slane %v174_v22, 1  ;;  %v209_v39 = vadd.f32 %v208_v23, %v207_v7  ;;  %v38_v7 = vld [vmem:[%s838_s0 + $0xd8] sm:$0xff] }
  0x17   :  { %v75_v28 = vrot.slane %v74_v12, 2  ;;  %v48_v40 = vadd.f32 %v47_v24, %v46_v8  ;;  %v55_v41 = vadd.f32 %v54_v25, %v53_v9  ;;  %v62_v42 = vadd.f32 %v61_v26, %v60_v10  ;;  %v39_v9 = vld [vmem:[%s838_s0 + $0xe0] sm:$0xff]  ;;  %v40_v10 = vld [vmem:[%s838_s0 + $0xe8] sm:$0xff]  ;;  %v21_v26 = vld [vmem:[%s838_s0 + $0x50] sm:$0xff] }
  0x18   :  { %v69_v43 = vadd.f32 %v68_v27, %v67_v11  ;;  %v83_v45 = vadd.f32 %v82_v29, %v81_v13  ;;  %v90_v46 = vadd.f32 %v89_v30, %v88_v14  ;;  %v97_v47 = vadd.f32 %v96_v31, %v95_v15  ;;  %v41_v11 = vld [vmem:[%s838_s0 + $0xf0] sm:$0xff]  ;;  %v22_v27 = vld [vmem:[%s838_s0 + $0x58] sm:$0xff] }
  0x19   :  { %v76_v44 = vadd.f32 %v75_v28, %v74_v12  ;;  %v182_v48 = vrot.slane %v181_v32, 1  ;;  %v189_v49 = vrot.slane %v188_v33, 1  ;;  %v196_v50 = vrot.slane %v195_v34, 1  ;;  %v23_v28 = vld [vmem:[%s838_s0 + $0x60] sm:$0xff] }
  0x1a   :  { %v203_v51 = vrot.slane %v202_v35, 1  ;;  %v598_v52 = vadd.f32 %v161_v36, %v160_v20  ;;  %v600_v53 = vadd.f32 %v168_v37, %v167_v21  ;;  %v602_v54 = vadd.f32 %v175_v38, %v174_v22  ;;  %v19_v20 = vld [vmem:[%s838_s0 + $0x40] sm:$0xff]  ;;  %v20_v21 = vld [vmem:[%s838_s0 + $0x48] sm:$0xff] }
  0x1b   :  { %v210_v55 = vrot.slane %v209_v39, 1  ;;  %v49_v57 = vrot.slane %v48_v40, 1  ;;  %v56_v58 = vrot.slane %v55_v41, 1  ;;  %v63_v59 = vrot.slane %v62_v42, 1 }
  0x1c   :  { %v70_v60 = vrot.slane %v69_v43, 1  ;;  %v77_v63 = vrot.slane %v76_v44, 1  ;;  %v84_v0 = vrot.slane %v83_v45, 1  ;;  %v91_v1 = vrot.slane %v90_v46, 1 }
  0x1d   :  { %v98_v2 = vrot.slane %v97_v47, 1  ;;  %v613_v3 = vadd.f32 %v182_v48, %v181_v32  ;;  %v615_v4 = vadd.f32 %v189_v49, %v188_v33  ;;  %v617_v5 = vadd.f32 %v196_v50, %v195_v34  ;;  %v24_v33 = vld [vmem:[%s838_s0 + $0x68] sm:$0xff]  ;;  %v25_v34 = vld [vmem:[%s838_s0 + $0x70] sm:$0xff] }
  0x1e   :  { %v619_v6 = vadd.f32 %v203_v51, %v202_v35  ;;  %v624_v8 = vadd.f32 %v210_v55, %v209_v39  ;;  %v212_v12 = vsel %vm43_vm0, %v35_v56, 0.0  ;;  %v219_v13 = vsel %vm43_vm0, %v36_v61, 0.0  ;;  %v26_v51 = vld [vmem:[%s838_s0 + $0x78] sm:$0xff] }
  0x1f   :  { %v226_v14 = vsel %vm43_vm0, %v37_v62, 0.0  ;;  %v638_v15 = vadd.f32 %v49_v57, %v48_v40  ;;  %v640_v16 = vadd.f32 %v56_v58, %v55_v41  ;;  %v642_v17 = vadd.f32 %v63_v59, %v62_v42 }
  0x20   :  { %v644_v18 = vadd.f32 %v70_v60, %v69_v43  ;;  %v655_v22 = vadd.f32 %v77_v63, %v76_v44  ;;  %v657_v23 = vadd.f32 %v84_v0, %v83_v45  ;;  %v659_v24 = vadd.f32 %v91_v1, %v90_v46 }
  0x21   :  { %v661_v25 = vadd.f32 %v98_v2, %v97_v47  ;;  %v213_v29 = vrot.slane %v212_v12, 4  ;;  %v220_v30 = vrot.slane %v219_v13, 4  ;;  %v227_v31 = vrot.slane %v226_v14, 4 }
  0x22   :  { %840 = vst [vmem:[#allocation2_spill] sm:$0xff] %v655_v22  ;;  %841 = vst [vmem:[#allocation3_spill] sm:$0xff] %v657_v23  ;;  %v233_v32 = vsel %vm43_vm0, %v38_v7, 0.0  ;;  %v240_v35 = vsel %vm43_vm0, %v39_v9, 0.0  ;;  %v247_v36 = vsel %vm43_vm0, %v40_v10, 0.0  ;;  %v254_v37 = vsel %vm43_vm0, %v41_v11, 0.0 }
  0x23   :  { %842 = vst [vmem:[#allocation4_spill] sm:$0xff] %v659_v24  ;;  %843 = vst [vmem:[#allocation5_spill] sm:$0xff] %v661_v25  ;;  %v261_v38 = vsel %vm43_vm0, %v42_v19, 0.0  ;;  %v100_v39 = vsel %vm43_vm0, %v19_v20, 0.0  ;;  %v107_v40 = vsel %vm43_vm0, %v20_v21, 0.0  ;;  %v114_v41 = vsel %vm43_vm0, %v21_v26, 0.0 }
  0x24   :  { %v121_v42 = vsel %vm43_vm0, %v22_v27, 0.0  ;;  %v234_v43 = vrot.slane %v233_v32, 4  ;;  %v128_v44 = vsel %vm43_vm0, %v23_v28, 0.0  ;;  %v135_v45 = vsel %vm43_vm0, %v24_v33, 0.0 }
  0x25   :  { %v142_v46 = vsel %vm43_vm0, %v25_v34, 0.0  ;;  %v241_v47 = vrot.slane %v240_v35, 4  ;;  %v248_v48 = vrot.slane %v247_v36, 4  ;;  %v255_v49 = vrot.slane %v254_v37, 4 }
  0x26   :  { %v262_v50 = vrot.slane %v261_v38, 4  ;;  %v101_v55 = vrot.slane %v100_v39, 4  ;;  %v108_v56 = vrot.slane %v107_v40, 4  ;;  %v115_v57 = vrot.slane %v114_v41, 4 }
  0x27   :  { %v122_v58 = vrot.slane %v121_v42, 4  ;;  %v214_v59 = vadd.f32 %v213_v29, %v212_v12  ;;  %v129_v60 = vrot.slane %v128_v44, 4  ;;  %v136_v61 = vrot.slane %v135_v45, 4 }
  0x28   :  { %v143_v62 = vrot.slane %v142_v46, 4  ;;  %v221_v63 = vadd.f32 %v220_v30, %v219_v13  ;;  %v228_v0 = vadd.f32 %v227_v31, %v226_v14  ;;  %v235_v1 = vadd.f32 %v234_v43, %v233_v32 }
  0x29   :  { %v149_v2 = vsel %vm43_vm0, %v26_v51, 0.0  ;;  %v242_v7 = vadd.f32 %v241_v47, %v240_v35  ;;  %v249_v9 = vadd.f32 %v248_v48, %v247_v36  ;;  %v256_v10 = vadd.f32 %v255_v49, %v254_v37 }
  0x2a   :  { %v263_v11 = vadd.f32 %v262_v50, %v261_v38  ;;  %v102_v19 = vadd.f32 %v101_v55, %v100_v39  ;;  %v109_v20 = vadd.f32 %v108_v56, %v107_v40  ;;  %v116_v21 = vadd.f32 %v115_v57, %v114_v41 }
  0x2b   :  { %v123_v26 = vadd.f32 %v122_v58, %v121_v42  ;;  %v130_v27 = vadd.f32 %v129_v60, %v128_v44  ;;  %v137_v28 = vadd.f32 %v136_v61, %v135_v45  ;;  %v144_v33 = vadd.f32 %v143_v62, %v142_v46 }
  0x2c   :  { %v150_v12 = vrot.slane %v149_v2, 4  ;;  %v215_v29 = vrot.slane %v214_v59, 2  ;;  %v222_v34 = vrot.slane %v221_v63, 2  ;;  %v229_v25 = vrot.slane %v228_v0, 2 }
  0x2d   :  { %v236_v13 = vrot.slane %v235_v1, 2  ;;  %v243_v14 = vrot.slane %v242_v7, 2  ;;  %v250_v30 = vrot.slane %v249_v9, 2  ;;  %v257_v31 = vrot.slane %v256_v10, 2 }
  0x2e   :  { %v264_v32 = vrot.slane %v263_v11, 2  ;;  %v103_v35 = vrot.slane %v102_v19, 2  ;;  %v110_v36 = vrot.slane %v109_v20, 2  ;;  %v117_v37 = vrot.slane %v116_v21, 2 }
  0x2f   :  { %v124_v38 = vrot.slane %v123_v26, 2  ;;  %v131_v39 = vrot.slane %v130_v27, 2  ;;  %v138_v40 = vrot.slane %v137_v28, 2  ;;  %v145_v41 = vrot.slane %v144_v33, 2 }
  0x30   :  { %v151_v42 = vadd.f32 %v150_v12, %v149_v2  ;;  %v216_v43 = vadd.f32 %v215_v29, %v214_v59  ;;  %v223_v44 = vadd.f32 %v222_v34, %v221_v63  ;;  %v230_v45 = vadd.f32 %v229_v25, %v228_v0 }
  0x31   :  { %v237_v46 = vadd.f32 %v236_v13, %v235_v1  ;;  %v244_v47 = vadd.f32 %v243_v14, %v242_v7  ;;  %v251_v48 = vadd.f32 %v250_v30, %v249_v9  ;;  %v258_v49 = vadd.f32 %v257_v31, %v256_v10 }
  0x32   :  { %v265_v50 = vadd.f32 %v264_v32, %v263_v11  ;;  %v104_v51 = vadd.f32 %v103_v35, %v102_v19  ;;  %v111_v55 = vadd.f32 %v110_v36, %v109_v20  ;;  %v118_v56 = vadd.f32 %v117_v37, %v116_v21 }
  0x33   :  { %v125_v57 = vadd.f32 %v124_v38, %v123_v26  ;;  %v132_v58 = vadd.f32 %v131_v39, %v130_v27  ;;  %v139_v60 = vadd.f32 %v138_v40, %v137_v28  ;;  %v146_v61 = vadd.f32 %v145_v41, %v144_v33 }
  0x34   :  { %v152_v62 = vrot.slane %v151_v42, 2  ;;  %v217_v24 = vrot.slane %v216_v43, 1  ;;  %v224_v23 = vrot.slane %v223_v44, 1  ;;  %v231_v22 = vrot.slane %v230_v45, 1 }
  0x35   :  { %v238_v2 = vrot.slane %v237_v46, 1  ;;  %v245_v59 = vrot.slane %v244_v47, 1  ;;  %v252_v63 = vrot.slane %v251_v48, 1  ;;  %v259_v25 = vrot.slane %v258_v49, 1 }
  0x36   :  { %v266_v0 = vrot.slane %v265_v50, 1  ;;  %v105_v1 = vrot.slane %v104_v51, 1  ;;  %v112_v7 = vrot.slane %v111_v55, 1  ;;  %v119_v9 = vrot.slane %v118_v56, 1 }
  0x37   :  { %v126_v10 = vrot.slane %v125_v57, 1  ;;  %v133_v11 = vrot.slane %v132_v58, 1  ;;  %v140_v19 = vrot.slane %v139_v60, 1  ;;  %v147_v20 = vrot.slane %v146_v61, 1 }
  0x38   :  { %v694_v21 = vadd.f32 %v152_v62, %v151_v42  ;;  %v696_v26 = vadd.f32 %v217_v24, %v216_v43  ;;  %v698_v27 = vadd.f32 %v224_v23, %v223_v44  ;;  %v700_v28 = vadd.f32 %v231_v22, %v230_v45 }
  0x39   :  { %v702_v33 = vadd.f32 %v238_v2, %v237_v46  ;;  %v704_v12 = vadd.f32 %v245_v59, %v244_v47  ;;  %v706_v29 = vadd.f32 %v252_v63, %v251_v48  ;;  %v708_v34 = vadd.f32 %v259_v25, %v258_v49 }
  0x3a   :  { %v710_v13 = vadd.f32 %v266_v0, %v265_v50  ;;  %v712_v14 = vadd.f32 %v105_v1, %v104_v51  ;;  %v714_v30 = vadd.f32 %v112_v7, %v111_v55  ;;  %v716_v24 = vadd.f32 %v119_v9, %v118_v56  ;;  %v844_v1 = vld [vmem:[#allocation2_spill] sm:$0xff]  ;;  %v845_v9 = vld [vmem:[#allocation3_spill] sm:$0xff] }
  0x3b   :  { %v718_v23 = vadd.f32 %v126_v10, %v125_v57  ;;  %v720_v31 = vadd.f32 %v133_v11, %v132_v58  ;;  %v722_v32 = vadd.f32 %v140_v19, %v139_v60  ;;  %v724_v35 = vadd.f32 %v147_v20, %v146_v61  ;;  %v846_v11 = vld [vmem:[#allocation4_spill] sm:$0xff]  ;;  %v847_v20 = vld [vmem:[#allocation5_spill] sm:$0xff] }
  0x3c   :  { %v154_v36 = vrot.slane %v694_v21, 1  ;;  %vm436_vm6 = vcmask 1046534   ;;  %vm439_vm7 = vcmask 1047559  }
  0x8e   :  { %v291_v22 = vpop.permute.xlu1 %290 }
  0x8f   :  { %v310_v37 = vrot.slane %v291_v22, 1  ;;  %v311_v38 = vrot.slane %v291_v22, 2  ;;  %v312_v39 = vrot.slane %v291_v22, 3  ;;  %v313_v40 = vrot.slane %v291_v22, 4 }
  0x90   :  { %v314_v41 = vrot.slane %v291_v22, 5  ;;  %v315_v42 = vrot.slane %v291_v22, 6  ;;  %v316_v43 = vrot.slane %v291_v22, 7  ;;  %v728_v44 = vmul.f32 %v291_v22, %v598_v52  ;;  %v283_v49 = vpop.permute.xlu0 %282 }
  0x91   :  { %v731_v45 = vmul.f32 %v310_v37, %v600_v53  ;;  %v734_v46 = vmul.f32 %v311_v38, %v602_v54  ;;  %v737_v47 = vmul.f32 %v312_v39, %v613_v3  ;;  %v740_v48 = vmul.f32 %v313_v40, %v615_v4 }
  0x92   :  { %v743_v50 = vmul.f32 %v314_v41, %v617_v5  ;;  %v746_v51 = vmul.f32 %v315_v42, %v619_v6  ;;  %v749_v52 = vmul.f32 %v316_v43, %v624_v8  ;;  %v296_v53 = vrot.slane %v283_v49, 1  ;;  %v295_v62 = vpop.permute.xlu1 %294 }
  0x93   :  { %v455_v54 = vrot.slane %v731_v45, 7  ;;  %v457_v3 = vrot.slane %v734_v46, 6  ;;  %v459_v55 = vrot.slane %v737_v47, 5  ;;  %v461_v4 = vrot.slane %v740_v48, 4 }
  0x94   :  { %v463_v5 = vrot.slane %v743_v50, 3  ;;  %v465_v56 = vrot.slane %v746_v51, 2  ;;  %v467_v6 = vrot.slane %v749_v52, 1  ;;  %v297_v57 = vrot.slane %v283_v49, 2 }
  0x95   :  { %v298_v8 = vrot.slane %v283_v49, 3  ;;  %v299_v58 = vrot.slane %v283_v49, 4  ;;  %v300_v60 = vrot.slane %v283_v49, 5  ;;  %v301_v61 = vrot.slane %v283_v49, 6 }
  0x96   :  { %v302_v2 = vrot.slane %v283_v49, 7  ;;  %v356_v59 = vmul.f32 %v283_v49, %v638_v15  ;;  %v357_v63 = vmul.f32 %v296_v53, %v640_v16  ;;  %v358_v25 = vmul.f32 %v297_v57, %v642_v17 }
  0x97   :  { %v359_v0 = vmul.f32 %v298_v8, %v644_v18  ;;  %v360_v7 = vmul.f32 %v299_v58, %v844_v1  ;;  %v361_v10 = vmul.f32 %v300_v60, %v845_v9  ;;  %v362_v19 = vmul.f32 %v301_v61, %v846_v11  ;;  %v287_v1 = vpop.permute.xlu0 %286 }
  0x98   :  { %v363_v22 = vmul.f32 %v302_v2, %v847_v20  ;;  %v420_v37 = vrot.slane %v357_v63, 7  ;;  %v423_v38 = vrot.slane %v358_v25, 6  ;;  %v317_v15 = vrot.slane %v295_v62, 1 }
  0x99   :  { %v426_v39 = vrot.slane %v359_v0, 5  ;;  %v429_v16 = vrot.slane %v360_v7, 4  ;;  %v432_v40 = vrot.slane %v361_v10, 3  ;;  %v435_v17 = vrot.slane %v362_v19, 2 }
  0x9a   :  { %v438_v41 = vrot.slane %v363_v22, 1  ;;  %v318_v42 = vrot.slane %v295_v62, 2  ;;  %v319_v18 = vrot.slane %v295_v62, 3  ;;  %v320_v43 = vrot.slane %v295_v62, 4 }
  0x9b   :  { %v321_v45 = vrot.slane %v295_v62, 5  ;;  %v322_v46 = vrot.slane %v295_v62, 6  ;;  %v323_v47 = vrot.slane %v295_v62, 7  ;;  %v380_v49 = vmul.f32 %v295_v62, %v696_v26 }
  0x9c   :  { %v381_v53 = vmul.f32 %v317_v15, %v698_v27  ;;  %v382_v57 = vmul.f32 %v318_v42, %v700_v28  ;;  %v383_v8 = vmul.f32 %v319_v18, %v702_v33  ;;  %v384_v58 = vmul.f32 %v320_v43, %v704_v12 }
  0x9d   :  { %v385_v60 = vmul.f32 %v321_v45, %v706_v29  ;;  %v386_v61 = vmul.f32 %v322_v46, %v708_v34  ;;  %v387_v2 = vmul.f32 %v323_v47, %v710_v13  ;;  %v422_v63 = vsel %vm421_vm1, %v420_v37, %v356_v59 }
  0x9e   :  { %v425_v25 = vsel %vm424_vm2, %v423_v38, %v422_v63  ;;  %v456_v26 = vsel %vm421_vm1, %v455_v54, %v728_v44  ;;  %v469_v27 = vrot.slane %v381_v53, 7  ;;  %v471_v62 = vrot.slane %v382_v57, 6 }
  0x9f   :  { %v428_v28 = vsel %vm427_vm3, %v426_v39, %v425_v25  ;;  %v458_v33 = vsel %vm424_vm2, %v457_v3, %v456_v26  ;;  %v473_v12 = vrot.slane %v383_v8, 5  ;;  %v475_v0 = vrot.slane %v384_v58, 4 }
  0xa0   :  { %v431_v29 = vsel %vm430_vm4, %v429_v16, %v428_v28  ;;  %v460_v34 = vsel %vm427_vm3, %v459_v55, %v458_v33  ;;  %v470_v13 = vsel %vm421_vm1, %v469_v27, %v380_v49  ;;  %v477_v59 = vrot.slane %v385_v60, 3 }
  0xa1   :  { %v434_v7 = vsel %vm433_vm5, %v432_v40, %v431_v29  ;;  %v462_v44 = vsel %vm430_vm4, %v461_v4, %v460_v34  ;;  %v472_v54 = vsel %vm424_vm2, %v471_v62, %v470_v13  ;;  %v479_v9 = vrot.slane %v386_v61, 2 }
  0xa2   :  { %v437_v3 = vsel %vm436_vm6, %v435_v17, %v434_v7  ;;  %v464_v10 = vsel %vm433_vm5, %v463_v5, %v462_v44  ;;  %v474_v55 = vsel %vm427_vm3, %v473_v12, %v472_v54  ;;  %v481_v11 = vrot.slane %v387_v2, 1 }
  0xa3   :  { %v440_v19 = vsel %vm439_vm7, %v438_v41, %v437_v3  ;;  %v466_v48 = vsel %vm436_vm6, %v465_v56, %v464_v10  ;;  %v476_v4 = vsel %vm430_vm4, %v475_v0, %v474_v55  ;;  %v303_v20 = vrot.slane %v287_v1, 1 }
  0xa4   :  { %v468_v22 = vsel %vm439_vm7, %v467_v6, %v466_v48  ;;  %v478_v50 = vsel %vm433_vm5, %v477_v59, %v476_v4  ;;  %487 = vst.msk [vmem:[%s839_s2] sm:$0xff] %vm43_vm0, %v440_v19  ;;  %v304_v5 = vrot.slane %v287_v1, 2  ;;  %v305_v37 = vrot.slane %v287_v1, 3 }
  0xa5   :  { %v480_v51 = vsel %vm436_vm6, %v479_v9, %v478_v50  ;;  %489 = vst.msk [vmem:[%s839_s2 + $0x10] sm:$0xff] %vm43_vm0, %v468_v22  ;;  %v306_v56 = vrot.slane %v287_v1, 4  ;;  %v307_v52 = vrot.slane %v287_v1, 5  ;;  %v308_v38 = vrot.slane %v287_v1, 6 }
  0xa6   :  { %v482_v6 = vsel %vm439_vm7, %v481_v11, %v480_v51  ;;  %v155_v15 = vadd.f32 %v154_v36, %v694_v21  ;;  %v309_v39 = vrot.slane %v287_v1, 7  ;;  %v365_v16 = vmul.f32 %v303_v20, %v714_v30 }
  0xa7   :  { %490 = vst.msk [vmem:[%s839_s2 + $0x18] sm:$0xff] %vm43_vm0, %v482_v6  ;;  %v366_v40 = vmul.f32 %v304_v5, %v716_v24  ;;  %v367_v17 = vmul.f32 %v305_v37, %v718_v23  ;;  %v368_v41 = vmul.f32 %v306_v56, %v720_v31  ;;  %v364_v42 = vmul.f32 %v287_v1, %v712_v14 }
  0xa8   :  { %v369_v18 = vmul.f32 %v307_v52, %v722_v32  ;;  %v441_v43 = vrot.slane %v365_v16, 7  ;;  %v370_v21 = vmul.f32 %v308_v38, %v724_v35  ;;  %v371_v30 = vmul.f32 %v309_v39, %v155_v15 }
  0xa9   :  { %v443_v36 = vrot.slane %v366_v40, 6  ;;  %v445_v46 = vrot.slane %v367_v17, 5  ;;  %v447_v49 = vrot.slane %v368_v41, 4 }
  0xaa   :  { %v442_v45 = vsel %vm421_vm1, %v441_v43, %v364_v42  ;;  %v449_v23 = vrot.slane %v369_v18, 3  ;;  %v451_v53 = vrot.slane %v370_v21, 2  ;;  %v453_v32 = vrot.slane %v371_v30, 1 }
  0xab   :  { %v444_v47 = vsel %vm424_vm2, %v443_v36, %v442_v45 }
  0xac   :  { %v446_v24 = vsel %vm427_vm3, %v445_v46, %v444_v47 }
  0xad   :  { %v448_v31 = vsel %vm430_vm4, %v447_v49, %v446_v24 }
  0xae   :  { %v450_v14 = vsel %vm433_vm5, %v449_v23, %v448_v31 }
  0xaf   :  { %v452_v57 = vsel %vm436_vm6, %v451_v53, %v450_v14 }
  0xb0   :  { %v454_v35 = vsel %vm439_vm7, %v453_v32, %v452_v57 }
  0xb1   :  { %488 = vst.msk [vmem:[%s839_s2 + $0x8] sm:$0xff] %vm43_vm0, %v454_v35 }

</bundles_post_ra>
